<compile_context>
chip_gen: v7x
topology: tpu7x:2x2x1
jax: 0.10.0
libtpu: 0.0.40
codegen_flags: <defaults>
</compile_context>

<pallas_src>
import functools
import math

import jax
import jax.numpy as jnp
from jax.experimental import pallas as pl
from jax.experimental.pallas import tpu as pltpu


def _embed_kernel(tok_ref, table_ref, out_ref, *, scale, vocab_size):
    # tok_ref:   (TB, 1)      int32  token ids for this block
    # table_ref: (V, E_pad)   f32    full embedding table (VMEM-resident)
    # out_ref:   (TB, E_pad)  f32    gathered + scaled embeddings
    ids = tok_ref[...]                                         # (TB, 1)
    tb = ids.shape[0]
    col = jax.lax.broadcasted_iota(jnp.int32, (tb, vocab_size), 1)
    one_hot = (col == ids).astype(table_ref.dtype)             # (TB, V)
    emb = jnp.dot(one_hot, table_ref[...],
                  preferred_element_type=jnp.float32)          # (TB, E_pad)
    out_ref[...] = (emb * scale).astype(out_ref.dtype)


def token_embedding(tokens: jax.Array, emb_table: jax.Array,
                    *, token_block: int = 128) -> jax.Array:
    """tokens: int [B, S]; emb_table: f32 [V, E] -> f32 [B, S, E]."""
    B, S = tokens.shape
    V, E = emb_table.shape
    N = B * S
    scale = math.sqrt(E)

    # Lane-dense embedding dim (pad to multiple of 128).
    E_pad = ((E + 127) // 128) * 128
    if E_pad != E:
        emb_table = jnp.pad(emb_table, ((0, 0), (0, E_pad - E)))

    # Sublane-dense token block (multiple of 8); shrink for tiny inputs.
    TB = token_block
    if N < TB:
        TB = max(8, ((N + 7) // 8) * 8)
    N_pad = ((N + TB - 1) // TB) * TB

    flat_tok = tokens.reshape(N).astype(jnp.int32)
    if N_pad != N:
        flat_tok = jnp.pad(flat_tok, (0, N_pad - N))  # pad ids -> row 0 (sliced off)
    tok_col = flat_tok.reshape(N_pad, 1)

    grid = (N_pad // TB,)
    kernel = functools.partial(_embed_kernel, scale=scale, vocab_size=V)

    out_flat = pl.pallas_call(
        kernel,
        grid=grid,
        in_specs=[
            # One (TB, 1) column of token ids per grid step.
            pl.BlockSpec((TB, 1), lambda i: (i, 0)),
            # Full table every step (constant block index -> stays in VMEM).
            pl.BlockSpec((V, E_pad), lambda i: (0, 0)),
        ],
        out_specs=pl.BlockSpec((TB, E_pad), lambda i: (i, 0)),
        out_shape=jax.ShapeDtypeStruct((N_pad, E_pad), emb_table.dtype),
        compiler_params=pltpu.CompilerParams(
            dimension_semantics=("parallel",),
        ),
    )(tok_col, emb_table)

    return out_flat[:N, :E].reshape(B, S, E)


def token_embedding_ref(tokens, emb_table):
    return emb_table[tokens] * math.sqrt(emb_table.shape[1])


if __name__ == "__main__":
    key = jax.random.PRNGKey(0)

    # Case 1: small demo shape matching the module (batch=2, seq=8, E=128).
    k_tok, k_emb, key = jax.random.split(key, 3)
    vocab_size, emb_size = 32, 128
    batch, seq = 2, 8
    emb_table = jax.random.normal(k_emb, (vocab_size, emb_size), dtype=jnp.float32)
    tokens = jax.random.randint(k_tok, (batch, seq), 0, vocab_size, dtype=jnp.int32)

    out = jax.block_until_ready(token_embedding(tokens, emb_table))
    ref = token_embedding_ref(tokens, emb_table)
    assert out.shape == (batch, seq, emb_size)
    assert jnp.allclose(out, ref, atol=1e-5, rtol=1e-5)

    # Case 2: multi-block grid + non-128 embedding dim (exercises padding path).
    k_tok2, k_emb2, key = jax.random.split(key, 3)
    vocab_size2, emb_size2 = 1000, 96
    batch2, seq2 = 4, 64
    emb_table2 = jax.random.normal(k_emb2, (vocab_size2, emb_size2), dtype=jnp.float32)
    tokens2 = jax.random.randint(k_tok2, (batch2, seq2), 0, vocab_size2, dtype=jnp.int32)

    out2 = jax.block_until_ready(token_embedding(tokens2, emb_table2))
    ref2 = token_embedding_ref(tokens2, emb_table2)
    assert out2.shape == (batch2, seq2, emb_size2)
    assert jnp.allclose(out2, ref2, atol=1e-5, rtol=1e-5)

    print("KERNEL_OK")
</pallas_src>

<mosaic_0001>
module attributes {stable_mosaic.version = 11 : i64} {
  func.func @_embed_kernel(%arg0: i32, %arg1: memref<16x1xi32, #tpu.memory_space<vmem>>, %arg2: memref<32x128xf32, #tpu.memory_space<vmem>>, %arg3: memref<16x128xf32, #tpu.memory_space<vmem>>) attributes {dimension_semantics = [#tpu.dimension_semantics<parallel>], iteration_bounds = array<i64: 1>, scalar_prefetch = 0 : i64, scratch_operands = 0 : i64, tpu.core_type = #tpu.core_type<tc>, window_params = [{transform_indices = @transform_0, window_bounds = array<i64: 16, 1>}, {pipeline_mode = #tpu.pipeline_mode<synchronous>, transform_indices = @transform_1, window_bounds = array<i64: 32, 128>}, {transform_indices = @transform_2, window_bounds = array<i64: 16, 128>}]} {
    %c0 = arith.constant 0 : index
    %c0_0 = arith.constant 0 : index
    %0 = vector.load %arg1[%c0, %c0_0] : memref<16x1xi32, #tpu.memory_space<vmem>>, vector<16x1xi32>
    %1 = tpu.iota {dimensions = array<i32: 1>} : vector<16x32xi32>
    %2 = vector.broadcast %0 : vector<16x1xi32> to vector<16x32xi32>
    %3 = arith.cmpi eq, %1, %2 : vector<16x32xi32>
    %4 = arith.extui %3 : vector<16x32xi1> to vector<16x32xi32>
    %5 = arith.sitofp %4 : vector<16x32xi32> to vector<16x32xf32>
    %c0_1 = arith.constant 0 : index
    %c0_2 = arith.constant 0 : index
    %6 = vector.load %arg2[%c0_1, %c0_2] : memref<32x128xf32, #tpu.memory_space<vmem>>, vector<32x128xf32>
    %cst = arith.constant dense<0.000000e+00> : vector<16x128xf32>
    %7 = tpu.matmul %5, %6, %cst {dimension_numbers = #tpu.dot_dimension_numbers<[1], [0], [0], [1], [0, 0, 1, 1], [], []>} : vector<16x32xf32>, vector<32x128xf32>, vector<16x128xf32> -> vector<16x128xf32>
    %cst_3 = arith.constant 11.3137083 : f32
    %8 = vector.broadcast %cst_3 : f32 to vector<16x128xf32>
    %9 = arith.mulf %7, %8 : vector<16x128xf32>
    %c0_4 = arith.constant 0 : index
    %c0_5 = arith.constant 0 : index
    %10 = vector.load %arg3[%c0_4, %c0_5] : memref<16x128xf32, #tpu.memory_space<vmem>>, vector<16x128xf32>
    tpu.vector_store %arg3[%c0_4, %c0_5], %9 {strides = array<i32>} : memref<16x128xf32, #tpu.memory_space<vmem>>, vector<16x128xf32>,
    return
  }
  func.func @transform_0(%arg0: i32) -> (i32, i32) {
    %c0_i32 = arith.constant 0 : i32
    %c0_i32_0 = arith.constant 0 : i32
    return %arg0, %c0_i32 : i32, i32
  }
  func.func @transform_1(%arg0: i32) -> (i32, i32) {
    %c0_i32 = arith.constant 0 : i32
    %c0_i32_0 = arith.constant 0 : i32
    %c0_i32_1 = arith.constant 0 : i32
    return %c0_i32, %c0_i32_0 : i32, i32
  }
  func.func @transform_2(%arg0: i32) -> (i32, i32) {
    %c0_i32 = arith.constant 0 : i32
    %c0_i32_0 = arith.constant 0 : i32
    return %arg0, %c0_i32 : i32, i32
  }
}

</mosaic_0001>

<bundles_post_ra>
// kernel: tpu_custom_call.1
= control target key start
LH: loop header
LB: loop body
LE: loop exit
PB: predicated region body
PF: predicated region fallthrough
CT: control target
= control target key end

     0   :  { %7 = vsyncpa [#allocation3], 0  ;;  %s290_s0 = inlined_call_operand.vmem [shape: s32[16,1], index: 0, kind: input, shape index: {}]   ;;  %s291_s1 = inlined_call_operand.hbm [shape: f32[32,128], index: 1, kind: input, shape index: {}]   ;;  %s292_s2 = inlined_call_operand.hbm [shape: f32[16,128], index: 2, kind: output, shape index: {}]  }
   0x1   :  { %8 = vsyncpa [#allocation4], 0  ;;  %s233_s9 = smov [#allocation2]   ;;  %s185_s13 = scalar_lea.hbm %s291_s1, 512 }
   0x2   :  { %s16_s10 = sshll.u32 %s233_s9, 4  ;;  %p186_p0 = scmp.ne.s32.totalorder %s291_s1, %s185_s13  ;;  %s17_s10 = int_to_ptr.vmem [resolvable:$true] %s16_s10 }
   0x3   :  { %p189_p1 = scmp.lt.u32.totalorder %s185_s13, %s291_s1 }
   0x5   :  { %p191_p2 = pnand %p189_p1, %p186_p0 }
   0x7   :  { %194 = shalt.err (!%p191_p2)
}
   0x8   :  { %s195_s18 = scalar_lea.vmem %s17_s10, 512  ;;  %p200_p4 = scmp.lt.s32.totalorder %s17_s10, %s17_s10 }
   0x9   :  { %p196_p3 = scmp.ne.s32.totalorder %s17_s10, %s195_s18  ;;  %p201_p5 = scmp.lt.s32.totalorder %s195_s18, %s195_s18 }
   0xb   :  { %p202_p6 = por %p201_p5, %p200_p4 }
   0xd   :  { %p203_p7 = pnand %p202_p6, %p196_p3 }
   0xf   :  { %206 = shalt.err (!%p203_p7)
}
  0x10   :  { %s234_s19 = smov 128   ;;  %s235_s20 = smov 8  }
  0x11   :  { %22 = dma.hbm_to_vmem [thread:$0]  %s291_s1, 512, %s17_s10, [#allocation3], %s234_s19, %s234_s19, %s235_s20  }
  0x12   :  { %229 = dma.done.wait [#allocation3], 512  }
  0x13   :  { %230 = vsyncadd [#allocation3], 4294966784  ;;  %v236_v0 = vmov 0   ;;  %v26_v1 = vld [vmem:[%s290_s0] sm:$0xff]  ;;  %v43_v3 = vld [vmem:[#allocation2 + $0x8] sm:$0xff]  ;;  %v28_v9 = vlaneseq  ;;  %vm46_vm0 = vcmask 261120  }
  0x14   :  { %184 = vset.pattern.permute.xlu0 %v236_v0  ;;  %v42_v2 = vld [vmem:[#allocation2] sm:$0xff]  ;;  %v44_v4 = vld [vmem:[#allocation2 + $0x10] sm:$0xff]  ;;  %v45_v5 = vld [vmem:[#allocation2 + $0x18] sm:$0xff]  ;;  %v237_v12 = vmov 0.0  }
  0x15   :  { %31 = vperm.xlu0 %184, %v26_v1   ;;  %v27_v6 = vld [vmem:[%s290_s0 + $0x8] sm:$0xff]  ;;  %v170_v7 = vpack.c.bf16 %v43_v3, %v42_v2  ;;  %v174_v8 = vpack.c.bf16 %v45_v5, %v44_v4  ;;  %v29_v10 = vand.u32 127, %v28_v9  ;;  %s238_s0 = smov [#allocation5]  }
  0x16   :  { %s137_s1 = sshll.u32 %s238_s0, 4  ;;  %s138_s1 = int_to_ptr.vmem [resolvable:$true] %s137_s1 }
  0x17   :  { %171 = vmatprep.subr.bf16.mxu0 %v170_v7  ;;  %s207_s27 = scalar_lea.vmem %s138_s1, 256  ;;  %p212_p9 = scmp.lt.s32.totalorder %s138_s1, %s138_s1 }
  0x18   :  { %173 = vmatpush3.bf16.msra.mxu0 %v170_v7  ;;  %p208_p8 = scmp.ne.s32.totalorder %s138_s1, %s207_s27  ;;  %p213_p10 = scmp.lt.s32.totalorder %s207_s27, %s207_s27 }
  0x19   :  { %34 = vperm.xlu0 %184, %v27_v6   ;;  %175 = vmatprep.subr.bf16.mxu0 %v174_v8 }
  0x1a   :  { %p214_p11 = por %p213_p10, %p212_p9 }
  0x1c   :  { %177 = vmatpush3.bf16.msra.mxu0 %v174_v8  ;;  %p215_p12 = pnand %p214_p11, %p208_p8 }
  0x94   :  { %v32_v11 = vpop.permute.xlu0 %31 }
  0x95   :  { %vm36_vm1 = vcmp.eq.s32.totalorder %v29_v10, %v32_v11 }
  0x96   :  { %v149_v13 = vsel %vm36_vm1, 1.0, %v237_v12 }
  0x97   :  { %167 = vmatprep.mubr.msk.f32.mxu0 %vm46_vm0, %v149_v13 }
  0x98   :  { %v35_v14 = vpop.permute.xlu0 %34 }
  0x99   :  { %vm37_vm2 = vcmp.eq.s32.totalorder %v29_v10, %v35_v14 }
  0x9a   :  { %v150_v15 = vsel %vm37_vm2, 1.0, %v237_v12 }
  0x9b   :  { %168 = vmatmul.mubr.msk.f32.vlgmr.msra.gmra.mrb[0].mxu0 %vm46_vm0, %v150_v15 }
 0x16e   :  { %v169_v16 = vpop.f32.mrb[0].mxu0 }
 0x16f   :  { %v129_v17 = vmul.f32 11.313708, %v169_v16  ;;  %v119_v18 = vpop.f32.mrb[1].mxu0 }
 0x170   :  { %v128_v19 = vmul.f32 11.313708, %v119_v18 }
 0x171   :  { %131 = vst [vmem:[#allocation5 + $0x8] sm:$0xff] %v129_v17 }
 0x172   :  { %130 = vst [vmem:[#allocation5] sm:$0xff] %v128_v19 }
 0x173   :  { %218 = shalt.err (!%p215_p12)
}
 0x174   :  { %s219_s30 = scalar_lea.hbm %s292_s2, 256 }
 0x175   :  { %p220_p13 = scmp.ne.s32.totalorder %s292_s2, %s219_s30  ;;  %p223_p0 = scmp.lt.u32.totalorder %s219_s30, %s292_s2 }
 0x177   :  { %p225_p1 = pnand %p223_p0, %p220_p13 }
 0x179   :  { %228 = shalt.err (!%p225_p1)
}
 0x17a   :  { %143 = dma.vmem_to_hbm [thread:$0]  %s138_s1, 256, %s292_s2, [#allocation4], %s234_s19, %s234_s19, %s235_s20  }
 0x17b   :  { %231 = dma.done.wait [#allocation4], 256  }
 0x17c   :  { %232 = vsyncadd [#allocation4], 4294967040 }
 0x17d   :  { %147 = vsyncpa [#allocation3], 1 }
 0x17e   :  { %148 = vsyncpa [#allocation4], 1 }

</bundles_post_ra>
